<compile_context>
chip_gen: v5e
topology: v5e:2x2
jax: 0.10.0
libtpu: 0.0.40
codegen_flags: <defaults>
</compile_context>

<pallas_src>
import functools

import jax
import jax.numpy as jnp
from jax import lax
from jax.experimental import pallas as pl
from jax.experimental.pallas import tpu as pltpu


def _reward_criterion_kernel(inp_ref, seq_ref, rew_ref, out_ref, *,
                             total_rows, block_rows):
    i = pl.program_id(0)

    seq = seq_ref[...]
    inp = inp_ref[...].astype(jnp.float32)
    rew = rew_ref[...].astype(jnp.float32)

    # mask[:, 0] = 1, mask[:, t] = (seq[:, t-1] > 0) for t >= 1
    mask_raw = (seq > 0).astype(jnp.float32)
    rolled = pltpu.roll(mask_raw, shift=1, axis=1)            # XLU lane rotate
    col = lax.broadcasted_iota(jnp.int32, (1, mask_raw.shape[1]), 1)
    mask = jnp.where(col == 0, jnp.float32(1.0), rolled)      # (TB, T) via bcast

    def emit(num, den):
        # Partial sums for this block: sublane 0 = numerator, sublane 1 =
        # denominator, broadcast across lanes -> one unmasked (8,128) vst.
        sub = lax.broadcasted_iota(jnp.int32, (8, 128), 0)
        out_ref[0, :, :] = jnp.where(
            sub == 0, num, jnp.where(sub == 1, den, jnp.float32(0.0)))

    def full_block():
        # All rows valid: plain multiply (mask zeroes non-contributing cols).
        emit(jnp.sum(-inp * rew * mask), jnp.sum(mask))

    def partial_block():
        # Padded DMA rows of the last block may hold garbage (even NaN): the
        # row mask *and* the select keep them out of both sums.
        row = lax.broadcasted_iota(jnp.int32, mask.shape, 0)
        valid = (i * block_rows + row) < total_rows
        m = jnp.where(valid, mask, jnp.float32(0.0))
        contrib = jnp.where(m > 0.0, -inp * rew, jnp.float32(0.0))
        emit(jnp.sum(contrib), jnp.sum(m))

    if total_rows % block_rows == 0:
        full_block()
    else:
        last = pl.num_programs(0) - 1
        pl.when(i != last)(full_block)
        pl.when(i == last)(partial_block)


def reward_criterion(inputs, seq, reward, *, block_rows=None,
                     per_input_tile_bytes=2 * 1024 * 1024):
    """inputs: [B, T] float (per-token log-probs), seq: [B, T] int, reward: [B, T] float."""
    B, T = inputs.shape
    assert seq.shape == (B, T) and reward.shape == (B, T)

    itemsizes = [inputs.dtype.itemsize, seq.dtype.itemsize, reward.dtype.itemsize]
    bytes_per_row = T * sum(itemsizes)
    # Packed-sublane alignment: 8 rows (4B dtypes), 16 (2B), 32 (1B).
    row_align = max(8, max(8 * (4 // s) for s in itemsizes if s <= 4))

    if block_rows is None:
        # Cap each streamed tile at ~per_input_tile_bytes: keeps the 3 double-
        # buffered tiles plus f32 body temporaries comfortably inside VMEM
        # (binding constraint on v7x's 64 MiB) at <2% roofline cost.
        max_rows = max(1, per_input_tile_bytes // (T * max(itemsizes)))
        if max_rows >= B:
            block_rows = B                                     # whole batch in one block
        else:
            block_rows = max(row_align, (max_rows // row_align) * row_align)
    assert block_rows == B or block_rows % 8 == 0, block_rows
    num_blocks = pl.cdiv(B, block_rows)

    kernel = functools.partial(_reward_criterion_kernel,
                               total_rows=B, block_rows=block_rows)

    # Explicit VMEM budget: double-buffered input tiles + ~8 tile-sized f32
    # body temporaries (upcasts, mask_raw/rolled/mask, contrib, row/valid) +
    # the tiny double-buffered output block + margin.
    streamed = 2 * block_rows * bytes_per_row
    temporaries = 8 * block_rows * T * 4
    out_bytes = 2 * 8 * 128 * 4
    vmem_needed = streamed + temporaries + out_bytes + (1 << 20)

    params = {"dimension_semantics": ("parallel",)}            # carry-free grid
    if vmem_needed > 16 * 1024 * 1024:                         # v5e default scoped VMEM
        params["vmem_limit_bytes"] = int(vmem_needed)

    block = lambda i: (i, 0)
    partials = pl.pallas_call(
        kernel,
        out_shape=jax.ShapeDtypeStruct((num_blocks, 8, 128), jnp.float32),
        grid_spec=pltpu.PrefetchScalarGridSpec(
            num_scalar_prefetch=0,
            grid=(num_blocks,),
            in_specs=[
                pl.BlockSpec((block_rows, T), block),          # input  [B, T]
                pl.BlockSpec((block_rows, T), block),          # seq    [B, T]
                pl.BlockSpec((block_rows, T), block),          # reward [B, T]
            ],
            out_specs=pl.BlockSpec((1, 8, 128), lambda i: (i, 0, 0)),
        ),
        compiler_params=pltpu.CompilerParams(**params),
    )(inputs, seq, reward)

    # Tiny final reduction + divide in the wrapper keeps the kernel grid
    # carry-free, so v7x can shard the HBM stream across both TensorCores.
    numer = jnp.sum(partials[:, 0, 0])
    denom = jnp.sum(partials[:, 1, 0])
    return numer / denom


def _reference(inputs, seq, reward):
    # Pure-JAX reference mirroring the PyTorch forward.
    mask = (seq > 0).astype(jnp.float32)
    mask = jnp.concatenate(
        [jnp.ones((mask.shape[0], 1), jnp.float32), mask[:, :-1]], axis=1)
    out = -inputs.astype(jnp.float32) * reward.astype(jnp.float32) * mask
    return jnp.sum(out) / jnp.sum(mask)


if __name__ == "__main__":
    key = jax.random.PRNGKey(0)

    def make_case(k, B, T, dtype=jnp.float32):
        k1, k2, k3 = jax.random.split(k, 3)
        inputs = -jax.nn.softplus(
            jax.random.normal(k1, (B, T), jnp.float32)).astype(dtype)
        seq = jax.random.randint(k2, (B, T), 0, 5, jnp.int32)
        seq = seq.at[:, T - 2:].set(0)            # padding at the tail of each row
        reward = jax.random.normal(k3, (B, T), jnp.float32).astype(dtype)
        return inputs, seq, reward

    k0, k1, k2, k3 = jax.random.split(key, 4)
    cases = [
        (make_case(k0, 2, 8), None),                  # canonical small shape, single block
        (make_case(k1, 24, 128), 8),                  # multi-block parallel grid
        (make_case(k2, 20, 128), 8),                  # partial last block: row masking path
        (make_case(k3, 16, 64, jnp.bfloat16), None),  # narrow streamed dtypes (bf16)
    ]
    for (inputs, seq, reward), br in cases:
        got = jax.block_until_ready(
            reward_criterion(inputs, seq, reward, block_rows=br))
        ref = _reference(inputs, seq, reward)
        assert jnp.allclose(got, ref, atol=1e-5, rtol=1e-4), (br, got, ref)

    print("KERNEL_OK")
</pallas_src>

<mosaic_0001>
module attributes {stable_mosaic.version = 11 : i64} {
  func.func @_reward_criterion_kernel(%arg0: i32, %arg1: memref<2x8xf32, #tpu.memory_space<vmem>>, %arg2: memref<2x8xi32, #tpu.memory_space<vmem>>, %arg3: memref<2x8xf32, #tpu.memory_space<vmem>>, %arg4: memref<1x8x128xf32, #tpu.memory_space<vmem>>) attributes {dimension_semantics = [#tpu.dimension_semantics<parallel>], iteration_bounds = array<i64: 1>, scalar_prefetch = 0 : i64, scratch_operands = 0 : i64, tpu.core_type = #tpu.core_type<tc>, window_params = [{transform_indices = @transform_0, window_bounds = array<i64: 2, 8>}, {transform_indices = @transform_1, window_bounds = array<i64: 2, 8>}, {transform_indices = @transform_2, window_bounds = array<i64: 2, 8>}, {transform_indices = @transform_3, window_bounds = array<i64: 1, 8, 128>}]} {
    %c0 = arith.constant 0 : index
    %c0_0 = arith.constant 0 : index
    %0 = vector.load %arg2[%c0, %c0_0] : memref<2x8xi32, #tpu.memory_space<vmem>>, vector<2x8xi32>
    %c0_1 = arith.constant 0 : index
    %c0_2 = arith.constant 0 : index
    %1 = vector.load %arg1[%c0_1, %c0_2] : memref<2x8xf32, #tpu.memory_space<vmem>>, vector<2x8xf32>
    %c0_3 = arith.constant 0 : index
    %c0_4 = arith.constant 0 : index
    %2 = vector.load %arg3[%c0_3, %c0_4] : memref<2x8xf32, #tpu.memory_space<vmem>>, vector<2x8xf32>
    %c0_i32 = arith.constant 0 : i32
    %3 = vector.broadcast %c0_i32 : i32 to vector<2x8xi32>
    %4 = arith.cmpi sgt, %0, %3 : vector<2x8xi32>
    %5 = arith.extui %4 : vector<2x8xi1> to vector<2x8xi32>
    %6 = arith.sitofp %5 : vector<2x8xi32> to vector<2x8xf32>
    %c1_i32 = arith.constant 1 : i32
    %7 = tpu.dynamic_rotate %6 by %c1_i32 dim 1 : vector<2x8xf32>, i32 -> vector<2x8xf32>
    %8 = tpu.iota {dimensions = array<i32: 1>} : vector<1x8xi32>
    %c0_i32_5 = arith.constant 0 : i32
    %9 = vector.broadcast %c0_i32_5 : i32 to vector<1x8xi32>
    %10 = arith.cmpi eq, %8, %9 : vector<1x8xi32>
    %cst = arith.constant 1.000000e+00 : f32
    %11 = vector.shape_cast %10 : vector<1x8xi1> to vector<1x8xi1>
    %12 = vector.broadcast %11 : vector<1x8xi1> to vector<2x8xi1>
    %13 = vector.broadcast %cst : f32 to vector<2x8xf32>
    %14 = arith.select %12, %13, %7 : vector<2x8xi1>, vector<2x8xf32>
    %cst_6 = arith.constant 0.000000e+00 : f32
    %15 = vector.broadcast %cst_6 : f32 to vector<2x8xf32>
    %16 = arith.subf %15, %1 : vector<2x8xf32>
    %17 = arith.mulf %16, %2 : vector<2x8xf32>
    %18 = arith.mulf %17, %14 : vector<2x8xf32>
    %19 = vector.shape_cast %18 : vector<2x8xf32> to vector<1x2x8xf32>
    %cst_7 = arith.constant dense<0.000000e+00> : vector<1xf32>
    %20 = vector.multi_reduction <add>, %19, %cst_7 [1, 2] : vector<1x2x8xf32> to vector<1xf32>
    %21 = vector.shape_cast %20 : vector<1xf32> to vector<1x1x1xf32>
    %22 = vector.extract %21[0, 0, 0] : f32 from vector<1x1x1xf32>
    %23 = vector.shape_cast %14 : vector<2x8xf32> to vector<1x2x8xf32>
    %cst_8 = arith.constant dense<0.000000e+00> : vector<1xf32>
    %24 = vector.multi_reduction <add>, %23, %cst_8 [1, 2] : vector<1x2x8xf32> to vector<1xf32>
    %25 = vector.shape_cast %24 : vector<1xf32> to vector<1x1x1xf32>
    %26 = vector.extract %25[0, 0, 0] : f32 from vector<1x1x1xf32>
    %27 = tpu.iota {dimensions = array<i32: 0>} : vector<8x128xi32>
    %c0_i32_9 = arith.constant 0 : i32
    %28 = vector.broadcast %c0_i32_9 : i32 to vector<8x128xi32>
    %29 = arith.cmpi eq, %27, %28 : vector<8x128xi32>
    %c1_i32_10 = arith.constant 1 : i32
    %30 = vector.broadcast %c1_i32_10 : i32 to vector<8x128xi32>
    %31 = arith.cmpi eq, %27, %30 : vector<8x128xi32>
    %cst_11 = arith.constant 0.000000e+00 : f32
    %32 = vector.broadcast %26 : f32 to vector<8x128xf32>
    %33 = vector.broadcast %cst_11 : f32 to vector<8x128xf32>
    %34 = arith.select %31, %32, %33 : vector<8x128xi1>, vector<8x128xf32>
    %35 = vector.broadcast %22 : f32 to vector<8x128xf32>
    %36 = arith.select %29, %35, %34 : vector<8x128xi1>, vector<8x128xf32>
    %c0_12 = arith.constant 0 : index
    %c0_13 = arith.constant 0 : index
    %c0_14 = arith.constant 0 : index
    %37 = vector.load %arg4[%c0_12, %c0_13, %c0_14] : memref<1x8x128xf32, #tpu.memory_space<vmem>>, vector<1x8x128xf32>
    %38 = vector.shape_cast %37 : vector<1x8x128xf32> to vector<8x128xf32>
    %39 = vector.shape_cast %36 : vector<8x128xf32> to vector<1x8x128xf32>
    tpu.vector_store %arg4[%c0_12, %c0_13, %c0_14], %39 {strides = array<i32>} : memref<1x8x128xf32, #tpu.memory_space<vmem>>, vector<1x8x128xf32>,
    return
  }
  func.func @transform_0(%arg0: i32) -> (i32, i32) {
    %c0_i32 = arith.constant 0 : i32
    %c0_i32_0 = arith.constant 0 : i32
    return %arg0, %c0_i32 : i32, i32
  }
  func.func @transform_1(%arg0: i32) -> (i32, i32) {
    %c0_i32 = arith.constant 0 : i32
    %c0_i32_0 = arith.constant 0 : i32
    return %arg0, %c0_i32 : i32, i32
  }
  func.func @transform_2(%arg0: i32) -> (i32, i32) {
    %c0_i32 = arith.constant 0 : i32
    %c0_i32_0 = arith.constant 0 : i32
    return %arg0, %c0_i32 : i32, i32
  }
  func.func @transform_3(%arg0: i32) -> (i32, i32, i32) {
    %c0_i32 = arith.constant 0 : i32
    %c0_i32_0 = arith.constant 0 : i32
    %c0_i32_1 = arith.constant 0 : i32
    return %arg0, %c0_i32, %c0_i32_0 : i32, i32, i32
  }
}

</mosaic_0001>

<bundles_post_ra>
// kernel: tpu_custom_call.1
= control target key start
LH: loop header
LB: loop body
LE: loop exit
PB: predicated region body
PF: predicated region fallthrough
CT: control target
= control target key end

     0   :  { %8 = vsyncpa [#allocation3], 0  ;;  %s283_s0 = inlined_call_operand.hbm [shape: f32[2,8], index: 0, kind: input, shape index: {}]   ;;  %s284_s1 = inlined_call_operand.hbm [shape: s32[2,8], index: 1, kind: input, shape index: {}]   ;;  %s285_s2 = inlined_call_operand.hbm [shape: f32[2,8], index: 2, kind: input, shape index: {}]   ;;  %s286_s3 = inlined_call_operand.hbm [shape: f32[1,8,128], index: 3, kind: output, shape index: {}]  }
   0x1   :  { %9 = vsyncpa [#allocation6], 0  ;;  %s27_s14 = sshll.u32 %s284_s1, 4  ;;  %s28_s14 = int_to_ptr.hbm [resolvable:$true] %s27_s14 }
   0x2   :  { %10 = vsyncpa [#allocation4], 0  ;;  %s244_s15 = smov [#allocation5]   ;;  %s16_s19 = sshll.u32 %s283_s0, 4  ;;  %s17_s19 = int_to_ptr.hbm [resolvable:$true] %s16_s19 }
   0x3   :  { %s29_s16 = sshll.u32 %s244_s15, 4  ;;  %s245_s20 = smov [#allocation2]   ;;  %s30_s16 = int_to_ptr.vmem [resolvable:$true] %s29_s16 }
   0x4   :  { %32 = dma.hbm_to_vmem [thread:$0]  %s28_s14, 32, %s30_s16, [#allocation6]  }
   0x5   :  { %s18_s21 = sshll.u32 %s245_s20, 4  ;;  %s38_s24 = sshll.u32 %s285_s2, 4  ;;  %s19_s21 = int_to_ptr.vmem [resolvable:$true] %s18_s21  ;;  %s39_s24 = int_to_ptr.hbm [resolvable:$true] %s38_s24 }
   0x6   :  { %21 = dma.hbm_to_vmem [thread:$0]  %s17_s19, 32, %s19_s21, [#allocation3]  }
   0x7   :  { %s246_s1 = smov [#allocation7]  }
   0x8   :  { %s40_s25 = sshll.u32 %s246_s1, 4  ;;  %s41_s25 = int_to_ptr.vmem [resolvable:$true] %s40_s25 }
   0x9   :  { %43 = dma.hbm_to_vmem [thread:$0]  %s39_s24, 32, %s41_s25, [#allocation6]  }
   0xa   :  { %238 = dma.done.wait [#allocation3], 32  }
   0xb   :  { %239 = vsyncadd [#allocation3], 4294967264 }
   0xc   :  { %240 = dma.done.wait [#allocation6], 64  }
   0xd   :  { %241 = vsyncadd [#allocation6], 4294967232  ;;  %v56_v0 = vld [vmem:[#allocation5] sm:$0x3]  ;;  %v247_v1 = vmov 0.0   ;;  %s248_s0 = smov 8   ;;  %v69_v7 = vlaneseq }
   0xe   :  { %vm59_vm0 = vcmp.gt.s32.totalorder %v56_v0, 0  ;;  %vm62_vm1 = vcmask 1047616   ;;  %s249_s2 = smov 121   ;;  %v57_v8 = vld [vmem:[#allocation2] sm:$0x3]  ;;  %vm82_vm3 = vcmask 58368  }
   0xf   :  { %v130_v2 = vsel %vm59_vm0, 1.0, %v247_v1  ;;  %v70_v9 = vand.u32 127, %v69_v7  ;;  %v79_v10 = vsub.f32 0.0, %v57_v8  ;;  %v58_v11 = vld [vmem:[#allocation7] sm:$0x3]  ;;  %v104_v32 = vshrl.u32 %v69_v7, 7 }
  0x10   :  { %63 = vrot.lane.b32.xlu0 %v130_v2, %s248_s0  ;;  %s250_s26 = smov [#allocation8]   ;;  %s119_s4 = sshll.u32 %s286_s3, 4  ;;  %s120_s4 = int_to_ptr.hbm [resolvable:$true] %s119_s4 }
  0x11   :  { %vm71_vm2 = vcmp.eq.s32.totalorder %v70_v9, 0  ;;  %v80_v12 = vmul.f32 %v79_v10, %v58_v11  ;;  %s117_s27 = sshll.u32 %s250_s26, 4  ;;  %vm106_vm4 = vcmp.eq.s32.totalorder %v104_v32, 1  ;;  %vm105_vm5 = vcmp.eq.s32.totalorder %v104_v32, 0  ;;  %s118_s27 = int_to_ptr.vmem [resolvable:$true] %s117_s27 }
  0x82   :  { %v64_v3 = vpop.permute.xlu0 %63 }
  0x83   :  { %v65_v4 = vsel %vm62_vm1, %v64_v3, %v130_v2 }
  0x84   :  { %66 = vrot.lane.b32.xlu0 %v65_v4, %s248_s0 }
  0xf6   :  { %v67_v5 = vpop.permute.xlu0 %66 }
  0xf7   :  { %v68_v6 = vsel %vm62_vm1, %v67_v5, %v130_v2 }
  0xf8   :  { %75 = vrot.lane.b32.xlu1 %v68_v6, %s249_s2 }
 0x16a   :  { %v76_v13 = vpop.permute.xlu1 %75 }
 0x16b   :  { %v78_v14 = vsel %vm71_vm2, 1.0, %v76_v13 }
 0x16c   :  { %v81_v15 = vmul.f32 %v80_v12, %v78_v14  ;;  %v93_v16 = vsel %vm82_vm3, %v78_v14, 0.0 }
 0x16d   :  { %94 = vadd.xlane.f32.xlu2 %v93_v16 }
 0x16e   :  { %v83_v17 = vsel %vm82_vm3, %v81_v15, 0.0 }
 0x16f   :  { %84 = vadd.xlane.f32.xlu1 %v83_v17 }
 0x1e0   :  { %v95_v18 = vpop.xlane.xlu2 %94 }
 0x1e1   :  { %v96_v19 = vrot.slane %v95_v18, 4 }
 0x1e2   :  { %v85_v20 = vpop.xlane.xlu1 %84 }
 0x1e3   :  { %v97_v21 = vadd.f32 %v96_v19, %v95_v18  ;;  %v86_v22 = vrot.slane %v85_v20, 4 }
 0x1e5   :  { %v98_v23 = vrot.slane %v97_v21, 2  ;;  %v87_v24 = vadd.f32 %v86_v22, %v85_v20 }
 0x1e7   :  { %v99_v25 = vadd.f32 %v98_v23, %v97_v21  ;;  %v88_v26 = vrot.slane %v87_v24, 2 }
 0x1e9   :  { %v89_v27 = vadd.f32 %v88_v26, %v87_v24  ;;  %v100_v28 = vrot.slane %v99_v25, 1 }
 0x1eb   :  { %v90_v29 = vrot.slane %v89_v27, 1  ;;  %v101_v31 = vadd.f32 %v100_v28, %v99_v25 }
 0x1ed   :  { %v91_v30 = vadd.f32 %v90_v29, %v89_v27 }
 0x1ef   :  { %131 = vpush %v91_v30 }
 0x1f0   :  { %133 = vpush %v101_v31 }
 0x220   :  { %s132_s28 = spop %131 }
 0x221   :  { %v109_v33 = vstv %s132_s28  ;;  %s134_s5 = spop %133 }
 0x222   :  { %v107_v34 = vstv %s134_s5 }
 0x223   :  { %v108_v35 = vsel %vm106_vm4, %v107_v34, 0.0 }
 0x224   :  { %v110_v36 = vsel %vm105_vm5, %v109_v33, %v108_v35 }
 0x225   :  { %111 = vst [vmem:[#allocation8] sm:$0xff] %v110_v36 }
 0x226   :  { %122 = dma.vmem_to_hbm [thread:$0]  %s118_s27, 128, %s120_s4, [#allocation4]  }
 0x227   :  { %242 = dma.done.wait [#allocation4], 128  }
 0x228   :  { %243 = vsyncadd [#allocation4], 4294967168 }
 0x229   :  { %127 = vsyncpa [#allocation3], 1 }
 0x22a   :  { %128 = vsyncpa [#allocation6], 1 }
 0x22b   :  { %129 = vsyncpa [#allocation4], 1 }

</bundles_post_ra>
